<compile_context>
chip_gen: v5e
topology: v5e:2x2
jax: 0.10.0
libtpu: 0.0.40
codegen_flags: <defaults>
</compile_context>

<pallas_src>
import jax
import jax.numpy as jnp
from jax.experimental import pallas as pl
from jax.experimental.pallas import tpu as pltpu

TB_MAX = 2048   # max batch tile (rides the 128-lane axis)


def mlp_kernel(x_ref, w2_ref, w3_ref, w4_ref, vec_ref, o_ref):
    x = x_ref[...]                                   # (1, TB)  batch on lanes

    # packed small parameters: columns of a (128, 8) array
    w1 = vec_ref[0:64, 0:1]                          # (64, 1)
    b1 = vec_ref[0:64, 1:2]                          # (64, 1)
    b2 = vec_ref[0:128, 2:3]                         # (128, 1)
    b3 = vec_ref[0:64, 3:4]                          # (64, 1)
    b4 = vec_ref[0:1, 4:5]                           # (1, 1)

    # layer 1 (contraction depth 1): broadcast multiply on the VPU, no MXU round trip
    h1 = jnp.maximum(w1 * x + b1, 0.0)               # (64, TB)

    # layers 2 & 3: MXU matmuls, unpadded hidden dims, f32 accumulation
    h2 = jnp.maximum(
        jnp.dot(w2_ref[...], h1, preferred_element_type=jnp.float32) + b2,
        0.0)                                         # (128, TB)
    h3 = jnp.maximum(
        jnp.dot(w3_ref[...], h2, preferred_element_type=jnp.float32) + b3,
        0.0)                                         # (64, TB)

    # layer 4 on the MXU: w4 padded to 8 rows (row 0 real), take row 0 + bias
    o8 = jnp.dot(w4_ref[...], h3, preferred_element_type=jnp.float32)   # (8, TB)
    o_ref[...] = (o8[0:1, :] + b4).astype(o_ref.dtype)                  # (1, TB) lane-dense


def init_params(key):
    """PyTorch nn.Linear layout: weight (out, in), bias (out,), U(-1/sqrt(in), 1/sqrt(in))."""
    dims = [(1, 64), (64, 128), (128, 64), (64, 1)]          # (in, out) per layer
    params = {}
    for idx, (fan_in, fan_out) in enumerate(dims, start=1):
        key, kw, kb = jax.random.split(key, 3)
        bound = 1.0 / (fan_in ** 0.5)
        params[f"w{idx}"] = jax.random.uniform(
            kw, (fan_out, fan_in), jnp.float32, -bound, bound)
        params[f"b{idx}"] = jax.random.uniform(
            kb, (fan_out,), jnp.float32, -bound, bound)
    return params


def _prepare_params(params):
    """Reshape to the feature-major kernel layout; pack the small vectors."""
    f32 = jnp.float32
    w2 = params["w2"].astype(f32)                                    # (128, 64)
    w3 = params["w3"].astype(f32)                                    # (64, 128)
    w4p = jnp.zeros((8, 64), f32).at[0, :].set(
        params["w4"][0, :].astype(f32))                              # (8, 64), row 0 real
    vecs = jnp.zeros((128, 8), f32)
    vecs = vecs.at[:64, 0].set(params["w1"][:, 0].astype(f32))       # w1 column
    vecs = vecs.at[:64, 1].set(params["b1"].astype(f32))             # b1
    vecs = vecs.at[:, 2].set(params["b2"].astype(f32))               # b2 (128)
    vecs = vecs.at[:64, 3].set(params["b3"].astype(f32))             # b3
    vecs = vecs.at[0, 4].set(params["b4"][0].astype(f32))            # b4 scalar
    return w2, w3, w4p, vecs


def _pick_tile(B, tb_max=TB_MAX):
    """Lane-aligned adaptive batch tile; >=2 tiles for large B (v7x megacore)."""
    if B <= 128:
        return 128
    half = -(-B // 2)                       # ceil(B/2) -> aim for two grid steps
    tb = -(-half // 128) * 128              # round up to a multiple of 128
    return max(128, min(tb, tb_max))


def net_forward(x, params, tb=None):
    """x: (B, 1) float32. params: PyTorch-layout weights/biases. Returns (B, 1)."""
    B = x.shape[0]
    assert x.shape[1] == 1
    if tb is None:
        tb = _pick_tile(B)
    n_tiles = (B + tb - 1) // tb
    B_pad = n_tiles * tb

    w2, w3, w4p, vecs = _prepare_params(params)

    # batch rides the lane axis; zero-pad to a multiple of the tile
    x_row = jnp.zeros((1, B_pad), jnp.float32).at[0, :B].set(
        x[:, 0].astype(jnp.float32))

    def full(shape):
        # full-array block, same block for every grid step -> stays resident in VMEM
        return pl.BlockSpec(shape, lambda i: (0, 0))

    out_row = pl.pallas_call(
        mlp_kernel,
        out_shape=jax.ShapeDtypeStruct((1, B_pad), jnp.float32),
        grid_spec=pltpu.PrefetchScalarGridSpec(
            num_scalar_prefetch=0,
            grid=(n_tiles,),
            in_specs=[
                pl.BlockSpec((1, tb), lambda i: (0, i)),    # x tile (lane-dense)
                full(w2.shape),                             # (128, 64)
                full(w3.shape),                             # (64, 128)
                full(w4p.shape),                            # (8, 64)
                full(vecs.shape),                           # (128, 8) packed vectors
            ],
            out_specs=pl.BlockSpec((1, tb), lambda i: (0, i)),   # lane-dense output
        ),
        compiler_params=pltpu.CompilerParams(
            dimension_semantics=("parallel",)),
    )(x_row, w2, w3, w4p, vecs)

    return out_row[0, :B].reshape(B, 1)


def reference(x, params):
    """Plain-JAX reference of the PyTorch forward (y = x @ W.T + b)."""
    h = x
    for i in (1, 2, 3):
        h = jnp.maximum(
            jnp.dot(h, params[f"w{i}"].T, precision=jax.lax.Precision.HIGHEST)
            + params[f"b{i}"], 0.0)
    return (jnp.dot(h, params["w4"].T, precision=jax.lax.Precision.HIGHEST)
            + params["b4"])


if __name__ == "__main__":
    key = jax.random.PRNGKey(0)
    key_x, key_p = jax.random.split(key)
    B = 8
    x = jax.random.normal(key_x, (B, 1), dtype=jnp.float32)
    params = init_params(key_p)

    out = net_forward(x, params)
    out = jax.block_until_ready(out)

    ref = reference(x, params)
    assert out.shape == (B, 1)
    assert jnp.allclose(out, ref, atol=1e-4, rtol=1e-4), \
        float(jnp.max(jnp.abs(out - ref)))

    print("KERNEL_OK")
</pallas_src>

<mosaic_0001>
module attributes {stable_mosaic.version = 11 : i64} {
  func.func @mlp_kernel(%arg0: i32, %arg1: memref<1x128xf32, #tpu.memory_space<vmem>>, %arg2: memref<128x64xf32, #tpu.memory_space<vmem>>, %arg3: memref<64x128xf32, #tpu.memory_space<vmem>>, %arg4: memref<8x64xf32, #tpu.memory_space<vmem>>, %arg5: memref<128x8xf32, #tpu.memory_space<vmem>>, %arg6: memref<1x128xf32, #tpu.memory_space<vmem>>) attributes {dimension_semantics = [#tpu.dimension_semantics<parallel>], iteration_bounds = array<i64: 1>, scalar_prefetch = 0 : i64, scratch_operands = 0 : i64, tpu.core_type = #tpu.core_type<tc>, window_params = [{transform_indices = @transform_0, window_bounds = array<i64: 1, 128>}, {pipeline_mode = #tpu.pipeline_mode<synchronous>, transform_indices = @transform_1, window_bounds = array<i64: 128, 64>}, {pipeline_mode = #tpu.pipeline_mode<synchronous>, transform_indices = @transform_2, window_bounds = array<i64: 64, 128>}, {pipeline_mode = #tpu.pipeline_mode<synchronous>, transform_indices = @transform_3, window_bounds = array<i64: 8, 64>}, {pipeline_mode = #tpu.pipeline_mode<synchronous>, transform_indices = @transform_4, window_bounds = array<i64: 128, 8>}, {transform_indices = @transform_5, window_bounds = array<i64: 1, 128>}]} {
    %c0 = arith.constant 0 : index
    %c0_0 = arith.constant 0 : index
    %0 = vector.load %arg1[%c0, %c0_0] : memref<1x128xf32, #tpu.memory_space<vmem>>, vector<1x128xf32>
    %c0_1 = arith.constant 0 : index
    %c0_2 = arith.constant 0 : index
    %1 = vector.load %arg5[%c0_1, %c0_2] : memref<128x8xf32, #tpu.memory_space<vmem>>, vector<64x1xf32>
    %c0_3 = arith.constant 0 : index
    %c1 = arith.constant 1 : index
    %2 = vector.load %arg5[%c0_3, %c1] : memref<128x8xf32, #tpu.memory_space<vmem>>, vector<64x1xf32>
    %c0_4 = arith.constant 0 : index
    %c2 = arith.constant 2 : index
    %3 = vector.load %arg5[%c0_4, %c2] : memref<128x8xf32, #tpu.memory_space<vmem>>, vector<128x1xf32>
    %c0_5 = arith.constant 0 : index
    %c3 = arith.constant 3 : index
    %4 = vector.load %arg5[%c0_5, %c3] : memref<128x8xf32, #tpu.memory_space<vmem>>, vector<64x1xf32>
    %c0_6 = arith.constant 0 : index
    %c4 = arith.constant 4 : index
    %5 = vector.load %arg5[%c0_6, %c4] : memref<128x8xf32, #tpu.memory_space<vmem>>, vector<1x1xf32>
    %6 = vector.broadcast %1 : vector<64x1xf32> to vector<64x128xf32>
    %7 = vector.broadcast %0 : vector<1x128xf32> to vector<64x128xf32>
    %8 = arith.mulf %6, %7 : vector<64x128xf32>
    %9 = vector.broadcast %2 : vector<64x1xf32> to vector<64x128xf32>
    %10 = arith.addf %8, %9 : vector<64x128xf32>
    %cst = arith.constant 0.000000e+00 : f32
    %11 = vector.broadcast %cst : f32 to vector<64x128xf32>
    %12 = arith.maximumf %10, %11 : vector<64x128xf32>
    %c0_7 = arith.constant 0 : index
    %c0_8 = arith.constant 0 : index
    %13 = vector.load %arg2[%c0_7, %c0_8] : memref<128x64xf32, #tpu.memory_space<vmem>>, vector<128x64xf32>
    %cst_9 = arith.constant dense<0.000000e+00> : vector<128x128xf32>
    %14 = tpu.matmul %13, %12, %cst_9 {dimension_numbers = #tpu.dot_dimension_numbers<[1], [0], [0], [1], [0, 0, 1, 1], [], []>} : vector<128x64xf32>, vector<64x128xf32>, vector<128x128xf32> -> vector<128x128xf32>
    %15 = vector.broadcast %3 : vector<128x1xf32> to vector<128x128xf32>
    %16 = arith.addf %14, %15 : vector<128x128xf32>
    %cst_10 = arith.constant 0.000000e+00 : f32
    %17 = vector.broadcast %cst_10 : f32 to vector<128x128xf32>
    %18 = arith.maximumf %16, %17 : vector<128x128xf32>
    %c0_11 = arith.constant 0 : index
    %c0_12 = arith.constant 0 : index
    %19 = vector.load %arg3[%c0_11, %c0_12] : memref<64x128xf32, #tpu.memory_space<vmem>>, vector<64x128xf32>
    %cst_13 = arith.constant dense<0.000000e+00> : vector<64x128xf32>
    %20 = tpu.matmul %19, %18, %cst_13 {dimension_numbers = #tpu.dot_dimension_numbers<[1], [0], [0], [1], [0, 0, 1, 1], [], []>} : vector<64x128xf32>, vector<128x128xf32>, vector<64x128xf32> -> vector<64x128xf32>
    %21 = vector.broadcast %4 : vector<64x1xf32> to vector<64x128xf32>
    %22 = arith.addf %20, %21 : vector<64x128xf32>
    %cst_14 = arith.constant 0.000000e+00 : f32
    %23 = vector.broadcast %cst_14 : f32 to vector<64x128xf32>
    %24 = arith.maximumf %22, %23 : vector<64x128xf32>
    %c0_15 = arith.constant 0 : index
    %c0_16 = arith.constant 0 : index
    %25 = vector.load %arg4[%c0_15, %c0_16] : memref<8x64xf32, #tpu.memory_space<vmem>>, vector<8x64xf32>
    %cst_17 = arith.constant dense<0.000000e+00> : vector<8x128xf32>
    %26 = tpu.matmul %25, %24, %cst_17 {dimension_numbers = #tpu.dot_dimension_numbers<[1], [0], [0], [1], [0, 0, 1, 1], [], []>} : vector<8x64xf32>, vector<64x128xf32>, vector<8x128xf32> -> vector<8x128xf32>
    %27 = vector.extract_strided_slice %26 {offsets = [0, 0], sizes = [1, 128], strides = [1, 1]} : vector<8x128xf32> to vector<1x128xf32>
    %28 = vector.broadcast %5 : vector<1x1xf32> to vector<1x128xf32>
    %29 = arith.addf %27, %28 : vector<1x128xf32>
    %c0_18 = arith.constant 0 : index
    %c0_19 = arith.constant 0 : index
    %30 = vector.load %arg6[%c0_18, %c0_19] : memref<1x128xf32, #tpu.memory_space<vmem>>, vector<1x128xf32>
    tpu.vector_store %arg6[%c0_18, %c0_19], %29 {strides = array<i32>} : memref<1x128xf32, #tpu.memory_space<vmem>>, vector<1x128xf32>,
    return
  }
  func.func @transform_0(%arg0: i32) -> (i32, i32) {
    %c0_i32 = arith.constant 0 : i32
    %c0_i32_0 = arith.constant 0 : i32
    return %c0_i32, %arg0 : i32, i32
  }
  func.func @transform_1(%arg0: i32) -> (i32, i32) {
    %c0_i32 = arith.constant 0 : i32
    %c0_i32_0 = arith.constant 0 : i32
    %c0_i32_1 = arith.constant 0 : i32
    return %c0_i32, %c0_i32_0 : i32, i32
  }
  func.func @transform_2(%arg0: i32) -> (i32, i32) {
    %c0_i32 = arith.constant 0 : i32
    %c0_i32_0 = arith.constant 0 : i32
    %c0_i32_1 = arith.constant 0 : i32
    return %c0_i32, %c0_i32_0 : i32, i32
  }
  func.func @transform_3(%arg0: i32) -> (i32, i32) {
    %c0_i32 = arith.constant 0 : i32
    %c0_i32_0 = arith.constant 0 : i32
    %c0_i32_1 = arith.constant 0 : i32
    return %c0_i32, %c0_i32_0 : i32, i32
  }
  func.func @transform_4(%arg0: i32) -> (i32, i32) {
    %c0_i32 = arith.constant 0 : i32
    %c0_i32_0 = arith.constant 0 : i32
    %c0_i32_1 = arith.constant 0 : i32
    return %c0_i32, %c0_i32_0 : i32, i32
  }
  func.func @transform_5(%arg0: i32) -> (i32, i32) {
    %c0_i32 = arith.constant 0 : i32
    %c0_i32_0 = arith.constant 0 : i32
    return %c0_i32, %arg0 : i32, i32
  }
}

</mosaic_0001>

<bundles_post_ra>
// kernel: tpu_custom_call.1
= control target key start
LH: loop header
LB: loop body
LE: loop exit
PB: predicated region body
PF: predicated region fallthrough
CT: control target
= control target key end

     0   :  { %v585_v1 = vmov 1   ;;  %v586_v2 = vmov 0   ;;  %s830_s0 = inlined_call_operand.vmem [shape: f32[1,128], index: 0, kind: input, shape index: {}]   ;;  %s831_s1 = inlined_call_operand.vmem [shape: f32[128,64], index: 1, kind: input, shape index: {}]   ;;  %s832_s2 = inlined_call_operand.vmem [shape: f32[64,128], index: 2, kind: input, shape index: {}]   ;;  %s833_s3 = inlined_call_operand.vmem [shape: f32[8,64], index: 3, kind: input, shape index: {}]   ;;  %s834_s4 = inlined_call_operand.vmem [shape: f32[128,8], index: 4, kind: input, shape index: {}]   ;;  %s835_s5 = inlined_call_operand.hbm [shape: f32[1,128], index: 5, kind: output, shape index: {}]  }
   0x1   :  { %v624_v0 = vld [vmem:[%s834_s4 + $0x38] sm:$0xff]  ;;  %540 = vset.pattern.permute.xlu1 %v585_v1  ;;  %539 = vset.pattern.permute.xlu0 %v586_v2 }
   0x2   :  { %119 = vperm.xlu1 %540, %v624_v0   ;;  %76 = vperm.xlu0 %539, %v624_v0  }
   0x3   :  { %10 = vsyncpa [#allocation3], 0  ;;  %v631_v3 = vld [vmem:[%s834_s4 + $0x30] sm:$0xff]  ;;  %542 = vset.pattern.permute.xlu2 %v585_v1  ;;  %v637_v4 = vld [vmem:[%s834_s4 + $0x28] sm:$0xff]  ;;  %v587_v32 = vmov 2   ;;  %vm226_vm0 = vcmask 523264  }
   0x4   :  { %115 = vperm.xlu2 %542, %v631_v3   ;;  %v643_v5 = vld [vmem:[%s834_s4 + $0x20] sm:$0xff]  ;;  %v650_v6 = vld [vmem:[%s834_s4 + $0x18] sm:$0xff]  ;;  %v658_v7 = vld [vmem:[%s834_s4 + $0x10] sm:$0xff]  ;;  %s590_s23 = smov [#allocation2]   ;;  %s483_s27 = sshll.u32 %s835_s5, 4  ;;  %s484_s27 = int_to_ptr.hbm [resolvable:$true] %s483_s27 }
   0x5   :  { %v663_v8 = vld [vmem:[%s834_s4 + $0x8] sm:$0xff]  ;;  %v672_v9 = vld [vmem:[%s834_s4] sm:$0xff]  ;;  %v37_v33 = vld [vmem:[%s834_s4 + $0x78] sm:$0xff]  ;;  %s481_s24 = sshll.u32 %s590_s23, 4  ;;  %s482_s24 = int_to_ptr.vmem [resolvable:$true] %s481_s24 }
   0x6   :  { %v558_v12 = vld [vmem:[%s830_s0] ss:$0 sm:$0xff]  ;;  %v32_v39 = vld [vmem:[%s834_s4 + $0x50] sm:$0xff]  ;;  %v31_v52 = vld [vmem:[%s834_s4 + $0x48] sm:$0xff] }
   0x7   :  { %v36_v40 = vld [vmem:[%s834_s4 + $0x70] sm:$0xff]  ;;  %v34_v44 = vld [vmem:[%s834_s4 + $0x60] sm:$0xff]  ;;  %v145_v57 = vld [vmem:[%s831_s1 + $0x38] sm:$0xff] }
   0x8   :  { %v138_v58 = vld [vmem:[%s831_s1] sm:$0xff]  ;;  %v35_v59 = vld [vmem:[%s834_s4 + $0x68] sm:$0xff]  ;;  %v33_v62 = vld [vmem:[%s834_s4 + $0x58] sm:$0xff] }
   0x9   :  { %v146_v60 = vld [vmem:[%s831_s1 + $0x40] sm:$0xff]  ;;  %v139_v61 = vld [vmem:[%s831_s1 + $0x8] sm:$0xff] }
   0xa   :  { %541 = vset.pattern.permute.xlu1 %v586_v2  ;;  %71 = vperm.xlu0 %539, %v631_v3   ;;  %v147_v63 = vld [vmem:[%s831_s1 + $0x48] sm:$0xff] }
   0xb   :  { %66 = vperm.xlu1 %541, %v637_v4  }
   0xc   :  { %543 = vset.pattern.permute.xlu2 %v586_v2 }
   0xd   :  { %61 = vperm.xlu2 %543, %v643_v5  }
  0x12   :  { %544 = vset.pattern.permute.xlu0 %v585_v1 }
  0x13   :  { %111 = vperm.xlu0 %544, %v637_v4   ;;  %56 = vperm.xlu1 %541, %v650_v6  }
  0x15   :  { %545 = vset.pattern.permute.xlu2 %v585_v1 }
  0x16   :  { %107 = vperm.xlu2 %545, %v643_v5  }
  0x1b   :  { %51 = vperm.xlu1 %541, %v658_v7   ;;  %546 = vset.pattern.permute.xlu0 %v586_v2 }
  0x1c   :  { %46 = vperm.xlu0 %546, %v663_v8  }
  0x1e   :  { %103 = vperm.xlu2 %545, %v650_v6  }
  0x23   :  { %547 = vset.pattern.permute.xlu1 %v585_v1 }
  0x24   :  { %99 = vperm.xlu1 %547, %v658_v7   ;;  %550 = vset.pattern.permute.xlu0 %v587_v32 }
  0x25   :  { %223 = vperm.xlu0 %550, %v37_v33  }
  0x26   :  { %548 = vset.pattern.permute.xlu2 %v586_v2  ;;  %v30_v2 = vld [vmem:[%s834_s4 + $0x40] sm:$0xff] }
  0x27   :  { %41 = vperm.xlu2 %548, %v672_v9  }
  0x2c   :  { %95 = vperm.xlu1 %547, %v663_v8  }
  0x2d   :  { %198 = vperm.xlu0 %550, %v32_v39  }
  0x2f   :  { %549 = vset.pattern.permute.xlu2 %v585_v1  ;;  %v140_v1 = vld [vmem:[%s831_s1 + $0x10] sm:$0xff] }
  0x30   :  { %91 = vperm.xlu2 %549, %v672_v9  }
  0x34   :  { %551 = vset.pattern.permute.xlu1 %v587_v32 }
  0x35   :  { %218 = vperm.xlu1 %551, %v36_v40   ;;  %183 = vperm.xlu0 %550, %v624_v0   ;;  %v588_v40 = vmov 3  }
  0x38   :  { %552 = vset.pattern.permute.xlu2 %v587_v32 }
  0x39   :  { %213 = vperm.xlu2 %552, %v35_v59  }
  0x3d   :  { %208 = vperm.xlu1 %551, %v34_v44   ;;  %171 = vperm.xlu0 %550, %v643_v5  }
  0x41   :  { %203 = vperm.xlu2 %552, %v33_v62  }
  0x45   :  { %193 = vperm.xlu1 %551, %v31_v52   ;;  %159 = vperm.xlu0 %550, %v663_v8  }
  0x49   :  { %188 = vperm.xlu2 %552, %v30_v2  }
  0x4d   :  { %179 = vperm.xlu1 %551, %v631_v3   ;;  %554 = vset.pattern.permute.xlu0 %v588_v40 }
  0x4e   :  { %389 = vperm.xlu0 %554, %v631_v3  }
  0x51   :  { %175 = vperm.xlu2 %552, %v637_v4  }
  0x55   :  { %167 = vperm.xlu1 %551, %v650_v6  }
  0x56   :  { %369 = vperm.xlu0 %554, %v663_v8  }
  0x59   :  { %163 = vperm.xlu2 %552, %v658_v7  }
  0x5d   :  { %155 = vperm.xlu1 %551, %v672_v9  }
  0x5e   :  { %v116_v10 = vpop.permute.xlu2 %115 }
  0x61   :  { %553 = vset.pattern.permute.xlu2 %v588_v40 }
  0x62   :  { %393 = vperm.xlu2 %553, %v624_v0  }
  0x65   :  { %555 = vset.pattern.permute.xlu1 %v588_v40 }
  0x66   :  { %385 = vperm.xlu1 %555, %v637_v4  }
  0x67   :  { %v62_v11 = vpop.permute.xlu2 %61 }
  0x68   :  { %v86_v24 = vmul.f32 %v558_v12, %v62_v11  ;;  %v141_v11 = vld [vmem:[%s831_s1 + $0x18] sm:$0xff] }
  0x6a   :  { %381 = vperm.xlu2 %553, %v643_v5  }
  0x6e   :  { %377 = vperm.xlu1 %555, %v650_v6  }
  0x70   :  { %v108_v18 = vpop.permute.xlu2 %107 }
  0x71   :  { %v126_v29 = vadd.f32 %v108_v18, %v86_v24  ;;  %v152_v18 = vld [vmem:[%s831_s1 + $0x70] sm:$0xff] }
  0x72   :  { %373 = vperm.xlu2 %553, %v658_v7  }
  0x73   :  { %v134_v36 = vmax.f32 %v126_v29, 0.0 }
  0x74   :  { %v120_v13 = vpop.permute.xlu1 %119  ;;  %v77_v14 = vpop.permute.xlu0 %76 }
  0x75   :  { %v89_v15 = vmul.f32 %v558_v12, %v77_v14  ;;  %v150_v14 = vld [vmem:[%s831_s1 + $0x60] sm:$0xff] }
  0x76   :  { %365 = vperm.xlu1 %555, %v672_v9  }
  0x77   :  { %v129_v16 = vadd.f32 %v120_v13, %v89_v15  ;;  %v142_v13 = vld [vmem:[%s831_s1 + $0x20] sm:$0xff]  ;;  %v143_v15 = vld [vmem:[%s831_s1 + $0x28] sm:$0xff] }
  0x78   :  { %v104_v26 = vpop.permute.xlu2 %103 }
  0x79   :  { %v137_v17 = vmax.f32 %v129_v16, 0.0  ;;  %v151_v16 = vld [vmem:[%s831_s1 + $0x68] sm:$0xff] }
  0x7b   :  { %283 = vmatpush.msra.mxu0 %v137_v17  ;;  %509 = vmatpush.msra.mxu3 %v137_v17  ;;  %v144_v17 = vld [vmem:[%s831_s1 + $0x30] sm:$0xff] }
  0x7c   :  { %v72_v19 = vpop.permute.xlu0 %71 }
  0x7d   :  { %v88_v20 = vmul.f32 %v558_v12, %v72_v19  ;;  %v67_v21 = vpop.permute.xlu1 %66  ;;  %v153_v19 = vld [vmem:[%s831_s1 + $0x78] sm:$0xff] }
  0x7e   :  { %v87_v25 = vmul.f32 %v558_v12, %v67_v21 }
  0x7f   :  { %v128_v22 = vadd.f32 %v116_v10, %v88_v20  ;;  %v148_v10 = vld [vmem:[%s831_s1 + $0x50] sm:$0xff] }
  0x81   :  { %v136_v23 = vmax.f32 %v128_v22, 0.0  ;;  %v42_v41 = vpop.permute.xlu2 %41 }
  0x82   :  { %v82_v48 = vmul.f32 %v558_v12, %v42_v41 }
  0x83   :  { %284 = vmatpush.msra.mxu0 %v136_v23  ;;  %510 = vmatpush.msra.mxu3 %v136_v23 }
  0x85   :  { %v112_v27 = vpop.permute.xlu0 %111  ;;  %v57_v28 = vpop.permute.xlu1 %56 }
  0x86   :  { %v127_v30 = vadd.f32 %v112_v27, %v87_v25  ;;  %v85_v31 = vmul.f32 %v558_v12, %v57_v28 }
  0x88   :  { %v135_v34 = vmax.f32 %v127_v30, 0.0  ;;  %v125_v35 = vadd.f32 %v104_v26, %v85_v31 }
  0x8a   :  { %285 = vmatpush.msra.mxu0 %v135_v34  ;;  %511 = vmatpush.msra.mxu3 %v135_v34  ;;  %v133_v37 = vmax.f32 %v125_v35, 0.0  ;;  %v92_v50 = vpop.permute.xlu2 %91 }
  0x8b   :  { %v122_v53 = vadd.f32 %v92_v50, %v82_v48 }
  0x8c   :  { %286 = vmatpush.msra.mxu0 %v134_v36  ;;  %512 = vmatpush.msra.mxu3 %v134_v36 }
  0x8d   :  { %v52_v38 = vpop.permute.xlu1 %51  ;;  %v130_v56 = vmax.f32 %v122_v53, 0.0 }
  0x8e   :  { %287 = vmatpush.msra.mxu0 %v133_v37  ;;  %513 = vmatpush.msra.mxu3 %v133_v37  ;;  %v84_v42 = vmul.f32 %v558_v12, %v52_v38  ;;  %v47_v46 = vpop.permute.xlu0 %46 }
  0x8f   :  { %v83_v49 = vmul.f32 %v558_v12, %v47_v46  ;;  %v149_v12 = vld [vmem:[%s831_s1 + $0x58] sm:$0xff] }
  0x93   :  { %v214_v30 = vpop.permute.xlu2 %213 }
  0x96   :  { %v100_v43 = vpop.permute.xlu1 %99 }
  0x97   :  { %v124_v45 = vadd.f32 %v100_v43, %v84_v42  ;;  %v224_v33 = vpop.permute.xlu0 %223 }
  0x99   :  { %v132_v47 = vmax.f32 %v124_v45, 0.0 }
  0x9b   :  { %288 = vmatpush.msra.mxu0 %v132_v47  ;;  %514 = vmatpush.msra.mxu3 %v132_v47  ;;  %v204_v36 = vpop.permute.xlu2 %203 }
  0x9e   :  { %v96_v51 = vpop.permute.xlu1 %95 }
  0x9f   :  { %v123_v54 = vadd.f32 %v96_v51, %v83_v49  ;;  %v199_v38 = vpop.permute.xlu0 %198 }
  0xa1   :  { %v131_v55 = vmax.f32 %v123_v54, 0.0 }
  0xa3   :  { %289 = vmatpush.msra.mxu0 %v131_v55  ;;  %515 = vmatpush.msra.mxu3 %v131_v55  ;;  %v189_v46 = vpop.permute.xlu2 %188 }
  0xa5   :  { %290 = vmatpush.msra.mxu0 %v130_v56  ;;  %516 = vmatpush.msra.mxu3 %v130_v56 }
  0xa6   :  { %499 = vmatmul.msk.f32.vlgmr.msra.gmra.mxu3 %vm226_vm0, %v145_v57  ;;  %492 = vmatmul.msk.f32.vlgmr.msra.gmra.mxu0 %vm226_vm0, %v138_v58 }
  0xa7   :  { %v219_v28 = vpop.permute.xlu1 %218  ;;  %v184_v50 = vpop.permute.xlu0 %183 }
  0xab   :  { %v176_v55 = vpop.permute.xlu2 %175 }
  0xae   :  { %500 = vmatmul.msk.f32.gmra.mxu3 %vm226_vm0, %v146_v60  ;;  %493 = vmatmul.msk.f32.gmra.mxu0 %vm226_vm0, %v139_v61 }
  0xaf   :  { %v209_v34 = vpop.permute.xlu1 %208  ;;  %v172_v58 = vpop.permute.xlu0 %171 }
  0xb6   :  { %501 = vmatmul.msk.f32.gmra.mxu3 %vm226_vm0, %v147_v63  ;;  %494 = vmatmul.msk.f32.gmra.mxu0 %vm226_vm0, %v140_v1 }
  0xb7   :  { %v194_v39 = vpop.permute.xlu1 %193  ;;  %v160_v9 = vpop.permute.xlu0 %159 }
  0xbe   :  { %502 = vmatmul.msk.f32.gmra.mxu3 %vm226_vm0, %v148_v10  ;;  %495 = vmatmul.msk.f32.gmra.mxu0 %vm226_vm0, %v141_v11  ;;  %v164_v10 = vpop.permute.xlu2 %163 }
  0xbf   :  { %v180_v51 = vpop.permute.xlu1 %179 }
  0xc6   :  { %503 = vmatmul.msk.f32.gmra.mxu3 %vm226_vm0, %v149_v12  ;;  %496 = vmatmul.msk.f32.gmra.mxu0 %vm226_vm0, %v142_v13 }
  0xc7   :  { %v168_v8 = vpop.permute.xlu1 %167 }
  0xce   :  { %504 = vmatmul.msk.f32.gmra.mxu3 %vm226_vm0, %v150_v14  ;;  %497 = vmatmul.msk.f32.gmra.mxu0 %vm226_vm0, %v143_v15 }
  0xcf   :  { %v156_v7 = vpop.permute.xlu1 %155 }
  0xd6   :  { %505 = vmatmul.msk.f32.gmra.mxu3 %vm226_vm0, %v151_v16  ;;  %498 = vmatmul.msk.f32.gmra.mxu0 %vm226_vm0, %v144_v17 }
  0xde   :  { %506 = vmatmul.msk.f32.gmra.mxu3 %vm226_vm0, %v152_v18 }
  0xe6   :  { %507 = vmatmul.msk.f32.gmra.mxu3 %vm226_vm0, %v153_v19 }
 0x123   :  { %v776_v23 = vpop.f32.mrf.mxu0 }
 0x124   :  { %v293_v17 = vadd.f32 %v776_v23, %v156_v7  ;;  %v357_v23 = vld [vmem:[%s832_s2 + $0x8] sm:$0xff] }
 0x129   :  { %v313_v20 = vpop.f32.mrf.mxu3 }
 0x12a   :  { %v314_v6 = vadd.f32 %v313_v20, %v184_v50  ;;  %v340_v20 = vmax.f32 %v293_v17, 0.0 }
 0x12b   :  { %v778_v25 = vpop.f32.mrf.mxu0 }
 0x12c   :  { %v347_v62 = vmax.f32 %v314_v6, 0.0  ;;  %v296_v16 = vadd.f32 %v778_v25, %v160_v9  ;;  %v358_v25 = vld [vmem:[%s832_s2 + $0x10] sm:$0xff]  ;;  %v445_v6 = vld [vmem:[%s833_s3] sm:$0xff] }
 0x12e   :  { %v341_v19 = vmax.f32 %v296_v16, 0.0 }
 0x131   :  { %v316_v21 = vpop.f32.mrf.mxu3 }
 0x132   :  { %v317_v56 = vadd.f32 %v316_v21, %v189_v46  ;;  %v356_v21 = vld [vmem:[%s832_s2] sm:$0xff] }
 0x133   :  { %v780_v27 = vpop.f32.mrf.mxu0 }
 0x134   :  { %v348_v61 = vmax.f32 %v317_v56, 0.0  ;;  %v299_v14 = vadd.f32 %v780_v27, %v164_v10  ;;  %v360_v27 = vld [vmem:[%s832_s2 + $0x20] sm:$0xff] }
 0x136   :  { %v342_v18 = vmax.f32 %v299_v14, 0.0 }
 0x139   :  { %v319_v22 = vpop.f32.mrf.mxu3 }
 0x13a   :  { %v320_v53 = vadd.f32 %v319_v22, %v194_v39  ;;  %v362_v22 = vld [vmem:[%s832_s2 + $0x30] sm:$0xff] }
 0x13b   :  { %v782_v31 = vpop.f32.mrf.mxu0 }
 0x13c   :  { %v349_v60 = vmax.f32 %v320_v53, 0.0  ;;  %v302_v11 = vadd.f32 %v782_v31, %v168_v8 }
 0x13e   :  { %v343_v15 = vmax.f32 %v302_v11, 0.0 }
 0x141   :  { %v322_v24 = vpop.f32.mrf.mxu3 }
 0x142   :  { %v323_v3 = vadd.f32 %v322_v24, %v199_v38  ;;  %v363_v24 = vld [vmem:[%s832_s2 + $0x38] sm:$0xff] }
 0x143   :  { %v304_v37 = vpop.f32.mrf.mxu0 }
 0x144   :  { %v350_v57 = vmax.f32 %v323_v3, 0.0  ;;  %v305_v1 = vadd.f32 %v304_v37, %v172_v58 }
 0x146   :  { %v344_v13 = vmax.f32 %v305_v1, 0.0 }
 0x149   :  { %v325_v26 = vpop.f32.mrf.mxu3 }
 0x14a   :  { %v326_v52 = vadd.f32 %v325_v26, %v204_v36  ;;  %v359_v26 = vld [vmem:[%s832_s2 + $0x18] sm:$0xff] }
 0x14b   :  { %v307_v47 = vpop.f32.mrf.mxu0 }
 0x14c   :  { %v351_v54 = vmax.f32 %v326_v52, 0.0  ;;  %v308_v63 = vadd.f32 %v307_v47, %v176_v55 }
 0x14e   :  { %v345_v12 = vmax.f32 %v308_v63, 0.0 }
 0x151   :  { %v328_v29 = vpop.f32.mrf.mxu3 }
 0x152   :  { %v329_v48 = vadd.f32 %v328_v29, %v209_v34  ;;  %v394_v34 = vpop.permute.xlu2 %393 }
 0x153   :  { %v310_v59 = vpop.f32.mrf.mxu0 }
 0x154   :  { %v352_v0 = vmax.f32 %v329_v48, 0.0  ;;  %v311_v5 = vadd.f32 %v310_v59, %v180_v51 }
 0x156   :  { %v346_v2 = vmax.f32 %v311_v5, 0.0 }
 0x159   :  { %v331_v32 = vpop.f32.mrf.mxu3 }
 0x15a   :  { %v332_v44 = vadd.f32 %v331_v32, %v214_v30  ;;  %v390_v32 = vpop.permute.xlu0 %389 }
 0x15c   :  { %v353_v4 = vmax.f32 %v332_v44, 0.0  ;;  %v382_v44 = vpop.permute.xlu2 %381 }
 0x161   :  { %v334_v35 = vpop.f32.mrf.mxu3 }
 0x162   :  { %v335_v42 = vadd.f32 %v334_v35, %v219_v28  ;;  %v361_v28 = vld [vmem:[%s832_s2 + $0x28] sm:$0xff] }
 0x164   :  { %v354_v49 = vmax.f32 %v335_v42, 0.0  ;;  %v589_v42 = vmov 4   ;;  %v374_v50 = vpop.permute.xlu2 %373 }
 0x165   :  { %556 = vset.pattern.permute.xlu2 %v589_v42  ;;  %557 = vset.pattern.permute.xlu0 %v589_v42 }
 0x169   :  { %v337_v41 = vpop.f32.mrf.mxu3 }
 0x16a   :  { %v338_v43 = vadd.f32 %v337_v41, %v224_v33  ;;  %v38_v41 = vld [vmem:[%s834_s4] sm:$0x1] }
 0x16b   :  { %471 = vperm.xlu2 %556, %v38_v41  }
 0x16c   :  { %v355_v45 = vmax.f32 %v338_v43, 0.0  ;;  %v386_v43 = vpop.permute.xlu1 %385 }
 0x16e   :  { %396 = vmatpush.msra.mxu1 %v355_v45  ;;  %517 = vmatpush.msra.mxu2 %v355_v45 }
 0x170   :  { %397 = vmatpush.msra.mxu1 %v354_v49  ;;  %518 = vmatpush.msra.mxu2 %v354_v49 }
 0x172   :  { %398 = vmatpush.msra.mxu1 %v353_v4  ;;  %519 = vmatpush.msra.mxu2 %v353_v4  ;;  %v370_v4 = vpop.permute.xlu0 %369 }
 0x174   :  { %399 = vmatpush.msra.mxu1 %v352_v0  ;;  %520 = vmatpush.msra.mxu2 %v352_v0  ;;  %v378_v46 = vpop.permute.xlu1 %377 }
 0x176   :  { %400 = vmatpush.msra.mxu1 %v351_v54  ;;  %521 = vmatpush.msra.mxu2 %v351_v54 }
 0x178   :  { %401 = vmatpush.msra.mxu1 %v350_v57  ;;  %522 = vmatpush.msra.mxu2 %v350_v57 }
 0x17a   :  { %402 = vmatpush.msra.mxu1 %v349_v60  ;;  %523 = vmatpush.msra.mxu2 %v349_v60 }
 0x17c   :  { %403 = vmatpush.msra.mxu1 %v348_v61  ;;  %524 = vmatpush.msra.mxu2 %v348_v61  ;;  %v366_v53 = vpop.permute.xlu1 %365 }
 0x17e   :  { %404 = vmatpush.msra.mxu1 %v347_v62  ;;  %525 = vmatpush.msra.mxu2 %v347_v62 }
 0x180   :  { %405 = vmatpush.msra.mxu1 %v346_v2  ;;  %526 = vmatpush.msra.mxu2 %v346_v2 }
 0x182   :  { %406 = vmatpush.msra.mxu1 %v345_v12  ;;  %527 = vmatpush.msra.mxu2 %v345_v12 }
 0x184   :  { %407 = vmatpush.msra.mxu1 %v344_v13  ;;  %528 = vmatpush.msra.mxu2 %v344_v13 }
 0x186   :  { %408 = vmatpush.msra.mxu1 %v343_v15  ;;  %529 = vmatpush.msra.mxu2 %v343_v15 }
 0x188   :  { %409 = vmatpush.msra.mxu1 %v342_v18  ;;  %530 = vmatpush.msra.mxu2 %v342_v18 }
 0x18a   :  { %410 = vmatpush.msra.mxu1 %v341_v19  ;;  %531 = vmatpush.msra.mxu2 %v341_v19 }
 0x18c   :  { %411 = vmatpush.msra.mxu1 %v340_v20  ;;  %532 = vmatpush.msra.mxu2 %v340_v20 }
 0x18d   :  { %412 = vmatmul.f32.vlgmr.msra.gmra.mxu1 %v356_v21  ;;  %430 = vmatmul.f32.vlgmr.msra.gmra.mxu2 %v362_v22 }
 0x195   :  { %415 = vmatmul.f32.gmra.mxu1 %v357_v23  ;;  %433 = vmatmul.f32.gmra.mxu2 %v363_v24 }
 0x19d   :  { %418 = vmatmul.f32.gmra.mxu1 %v358_v25 }
 0x1a5   :  { %421 = vmatmul.f32.gmra.mxu1 %v359_v26 }
 0x1ad   :  { %424 = vmatmul.f32.gmra.mxu1 %v360_v27 }
 0x1b5   :  { %427 = vmatmul.f32.gmra.mxu1 %v361_v28 }
 0x1c5   :  { %v472_v60 = vpop.permute.xlu2 %471 }
 0x20a   :  { %v413_v29 = vpop.f32.mrf.mxu1 }
 0x20b   :  { %v414_v56 = vadd.f32 %v413_v29, %v366_v53 }
 0x20d   :  { %v437_v59 = vmax.f32 %v414_v56, 0.0 }
 0x210   :  { %v431_v30 = vpop.f32.mrf.mxu2 }
 0x211   :  { %v432_v33 = vadd.f32 %v431_v30, %v390_v32 }
 0x212   :  { %v416_v31 = vpop.f32.mrf.mxu1 }
 0x213   :  { %v443_v38 = vmax.f32 %v432_v33, 0.0  ;;  %v417_v54 = vadd.f32 %v416_v31, %v370_v4 }
 0x215   :  { %v438_v58 = vmax.f32 %v417_v54, 0.0 }
 0x218   :  { %v434_v35 = vpop.f32.mrf.mxu2 }
 0x219   :  { %v435_v36 = vadd.f32 %v434_v35, %v394_v34 }
 0x21a   :  { %v419_v37 = vpop.f32.mrf.mxu1 }
 0x21b   :  { %v444_v39 = vmax.f32 %v435_v36, 0.0  ;;  %v420_v3 = vadd.f32 %v419_v37, %v374_v50 }
 0x21d   :  { %457 = vmatpush.msrb.mxu2 %v444_v39  ;;  %v439_v57 = vmax.f32 %v420_v3, 0.0 }
 0x21f   :  { %458 = vmatpush.msrb.mxu2 %v443_v38 }
 0x222   :  { %v422_v40 = vpop.f32.mrf.mxu1 }
 0x223   :  { %v423_v51 = vadd.f32 %v422_v40, %v378_v46 }
 0x225   :  { %v440_v55 = vmax.f32 %v423_v51, 0.0 }
 0x22a   :  { %v425_v45 = vpop.f32.mrf.mxu1 }
 0x22b   :  { %v426_v48 = vadd.f32 %v425_v45, %v382_v44 }
 0x22d   :  { %v441_v0 = vmax.f32 %v426_v48, 0.0 }
 0x232   :  { %v428_v47 = vpop.f32.mrf.mxu1 }
 0x233   :  { %v429_v49 = vadd.f32 %v428_v47, %v386_v43 }
 0x235   :  { %v442_v52 = vmax.f32 %v429_v49, 0.0 }
 0x237   :  { %459 = vmatpush.msrb.mxu2 %v442_v52 }
 0x239   :  { %460 = vmatpush.msrb.mxu2 %v441_v0 }
 0x23b   :  { %461 = vmatpush.msrb.mxu2 %v440_v55 }
 0x23d   :  { %462 = vmatpush.msrb.mxu2 %v439_v57 }
 0x23f   :  { %463 = vmatpush.msrb.mxu2 %v438_v58 }
 0x241   :  { %464 = vmatpush.msrb.mxu2 %v437_v59 }
 0x242   :  { %508 = vmatmul.msk.f32.vlgmr.msrb.gmra.mxu2 %vm226_vm0, %v445_v6 }
 0x2c5   :  { %v466_v8 = vpop.f32.mrf.mxu2 }
 0x2c6   :  { %v474_v61 = vadd.f32 %v472_v60, %v466_v8 }
 0x2c8   :  { %475 = vst [vmem:[#allocation2] sm:$0x1] %v474_v61 }
 0x2c9   :  { %486 = dma.vmem_to_hbm [thread:$0]  %s482_s24, 16, %s484_s27, [#allocation3]  }
 0x2ca   :  { %583 = dma.done.wait [#allocation3], 16  }
 0x2cb   :  { %584 = vsyncadd [#allocation3], 4294967280 }
 0x2cc   :  { %491 = vsyncpa [#allocation3], 1 }

</bundles_post_ra>
